<compile_context>
chip_gen: v7x
topology: tpu7x:2x2x1
jax: 0.10.0
libtpu: 0.0.40
codegen_flags: <defaults>
</compile_context>

<pallas_src>
import functools

import jax
import jax.numpy as jnp
from jax.experimental import pallas as pl
from jax.experimental.pallas import tpu as pltpu

INPUT_DIM = 8     # LunarLanderContinuous-v2 observation dim
ACTION_DIM = 2    # action dim
HIDDEN = 256
HEAD_PAD = 128    # lane-dense padded head width (col 0 = q1, col 1 = q2, rest = 0)


def critic_kernel(s_ref, a_ref, w1s_ref, w1a_ref, b1_ref,
                  w2a_ref, b2a_ref, w2b_ref, b2b_ref,
                  w3a_ref, w3b_ref, b3_ref, out_ref):
    # Layer 1 for both nets at once; the state/action concat is folded into two row-split matmuls:
    #   sa @ W1 == state @ W1[:in_dim] + action @ W1[in_dim:]
    h1 = jnp.tanh(
        jnp.dot(s_ref[...], w1s_ref[...], preferred_element_type=jnp.float32)
        + jnp.dot(a_ref[...], w1a_ref[...], preferred_element_type=jnp.float32)
        + b1_ref[...]
    )
    # Layer 2: per-network (256,256) matmuls.  The 256-wide slices of h1 are lane-aligned
    # (256 = 2*128) so no layout copies; this does half the MXU work / W2 DMA of the previous
    # block-diagonal (512,512) formulation while computing the exact same numbers.
    h1a = h1[:, :HIDDEN]
    h1b = h1[:, HIDDEN:]
    h2a = jnp.tanh(
        jnp.dot(h1a, w2a_ref[...], preferred_element_type=jnp.float32) + b2a_ref[...])
    h2b = jnp.tanh(
        jnp.dot(h1b, w2b_ref[...], preferred_element_type=jnp.float32) + b2b_ref[...])
    # Heads: lane-padded (HIDDEN, 128) per net; column 0 carries q1, column 1 carries q2,
    # columns 2..127 are exact zeros.  Single lane-dense output slab -> unmasked vst writeback.
    out_ref[...] = (
        jnp.dot(h2a, w3a_ref[...], preferred_element_type=jnp.float32)
        + jnp.dot(h2b, w3b_ref[...], preferred_element_type=jnp.float32)
        + b3_ref[...]
    )


def pack_params(params):
    """Pack the two per-network parameter sets into fused kernel operands (do this once)."""
    q1, q2 = params["q1"], params["q2"]

    w1 = jnp.concatenate([q1["w1"], q2["w1"]], axis=1)          # (in+act, 512)
    b1 = jnp.concatenate([q1["b1"], q2["b1"]], axis=1)          # (1, 512)

    w3a = jnp.zeros((HIDDEN, HEAD_PAD), jnp.float32).at[:, 0].set(q1["w3"][:, 0])
    w3b = jnp.zeros((HIDDEN, HEAD_PAD), jnp.float32).at[:, 1].set(q2["w3"][:, 0])
    b3 = jnp.zeros((1, HEAD_PAD), jnp.float32)
    b3 = b3.at[0, 0].set(q1["b3"][0, 0]).at[0, 1].set(q2["b3"][0, 0])

    return {
        "w1s": w1[:INPUT_DIM], "w1a": w1[INPUT_DIM:], "b1": b1,
        "w2a": q1["w2"], "b2a": q1["b2"],
        "w2b": q2["w2"], "b2b": q2["b2"],
        "w3a": w3a, "w3b": w3b, "b3": b3,
    }


def _round_up(x, m):
    return (x + m - 1) // m * m


@functools.partial(jax.jit, static_argnames=("batch_block",))
def critic_forward(state, action, packed, *, batch_block=512):
    """state: (B, INPUT_DIM) f32, action: (B, ACTION_DIM) f32. Returns (q1, q2), each (B, 1)."""
    batch = state.shape[0]

    if batch <= batch_block:
        # Launch / weight-DMA-bound regime: a single tile, padded to the 8-row sublane granule.
        # Splitting a latency-bound kernel across cores would be pure overhead.
        bb = _round_up(max(batch, 8), 8)
    else:
        # Compute-bound regime: fixed batch_block tiles (>= 2 grid steps), so the "parallel"
        # batch axis can shard across v7x's two TensorCores; per-tile activations stay a few MiB.
        bb = batch_block
    padded = _round_up(batch, bb)
    if padded != batch:
        pad = padded - batch
        state = jnp.pad(state, ((0, pad), (0, 0)))
        action = jnp.pad(action, ((0, pad), (0, 0)))
    grid = (padded // bb,)

    batch_map = lambda i: (i, 0)
    const_map = lambda i: (0, 0)   # weights/biases stay VMEM-resident across batch tiles

    out = pl.pallas_call(
        critic_kernel,
        out_shape=jax.ShapeDtypeStruct((padded, HEAD_PAD), jnp.float32),
        grid=grid,
        in_specs=[
            pl.BlockSpec((bb, INPUT_DIM), batch_map),
            pl.BlockSpec((bb, ACTION_DIM), batch_map),
            pl.BlockSpec((INPUT_DIM, 2 * HIDDEN), const_map),
            pl.BlockSpec((ACTION_DIM, 2 * HIDDEN), const_map),
            pl.BlockSpec((1, 2 * HIDDEN), const_map),
            pl.BlockSpec((HIDDEN, HIDDEN), const_map),
            pl.BlockSpec((1, HIDDEN), const_map),
            pl.BlockSpec((HIDDEN, HIDDEN), const_map),
            pl.BlockSpec((1, HIDDEN), const_map),
            pl.BlockSpec((HIDDEN, HEAD_PAD), const_map),
            pl.BlockSpec((HIDDEN, HEAD_PAD), const_map),
            pl.BlockSpec((1, HEAD_PAD), const_map),
        ],
        out_specs=pl.BlockSpec((bb, HEAD_PAD), batch_map),
        compiler_params=pltpu.CompilerParams(
            dimension_semantics=("parallel",)),
    )(state, action,
      packed["w1s"], packed["w1a"], packed["b1"],
      packed["w2a"], packed["b2a"], packed["w2b"], packed["b2b"],
      packed["w3a"], packed["w3b"], packed["b3"])

    # Slice the two real columns out of the lane-dense slab and drop padded rows.
    return out[:batch, 0:1], out[:batch, 1:2]


def init_params(key):
    """PyTorch nn.Linear-style init: U(-1/sqrt(fan_in), 1/sqrt(fan_in)); weights stored (in, out)."""
    def linear(k, fan_in, fan_out):
        kw, kb = jax.random.split(k)
        bound = 1.0 / jnp.sqrt(float(fan_in))
        w = jax.random.uniform(kw, (fan_in, fan_out), jnp.float32, -bound, bound)
        b = jax.random.uniform(kb, (1, fan_out), jnp.float32, -bound, bound)
        return w, b

    keys = jax.random.split(key, 6)

    def qnet(k1, k2, k3):
        w1, b1 = linear(k1, INPUT_DIM + ACTION_DIM, HIDDEN)
        w2, b2 = linear(k2, HIDDEN, HIDDEN)
        w3, b3 = linear(k3, HIDDEN, 1)
        return {"w1": w1, "b1": b1, "w2": w2, "b2": b2, "w3": w3, "b3": b3}

    return {"q1": qnet(*keys[:3]), "q2": qnet(*keys[3:])}


def critic_forward_ref(state, action, params):
    """Plain-JAX reference matching the PyTorch Critic.forward exactly."""
    sa = jnp.concatenate([state, action], axis=1)

    def qnet(p):
        h1 = jnp.tanh(sa @ p["w1"] + p["b1"])
        h2 = jnp.tanh(h1 @ p["w2"] + p["b2"])
        return h2 @ p["w3"] + p["b3"]

    return qnet(params["q1"]), qnet(params["q2"])


if __name__ == "__main__":
    key = jax.random.PRNGKey(0)
    kp, ks, ka = jax.random.split(key, 3)

    params = init_params(kp)
    packed = pack_params(params)   # pack once; reuse across calls

    # Small-batch path (single 8-row tile, launch-bound regime).
    batch = 8
    state = jax.random.normal(ks, (batch, INPUT_DIM), jnp.float32)
    action = jax.random.normal(ka, (batch, ACTION_DIM), jnp.float32)

    q1, q2 = critic_forward(state, action, packed)
    jax.block_until_ready((q1, q2))

    q1_ref, q2_ref = critic_forward_ref(state, action, params)
    assert q1.shape == (batch, 1) and q2.shape == (batch, 1)
    assert jnp.allclose(q1, q1_ref, atol=1e-4, rtol=1e-4)
    assert jnp.allclose(q2, q2_ref, atol=1e-4, rtol=1e-4)

    # Non-divisible batch exercises the padded, multi-tile "parallel" path
    # (batch_block=128 -> 3 tiles of 128 with a zero-padded tail).
    big = 300
    ks2, ka2 = jax.random.split(jax.random.PRNGKey(1))
    state_b = jax.random.normal(ks2, (big, INPUT_DIM), jnp.float32)
    action_b = jax.random.normal(ka2, (big, ACTION_DIM), jnp.float32)
    q1b, q2b = critic_forward(state_b, action_b, packed, batch_block=128)
    jax.block_until_ready((q1b, q2b))
    q1b_ref, q2b_ref = critic_forward_ref(state_b, action_b, params)
    assert q1b.shape == (big, 1) and q2b.shape == (big, 1)
    assert jnp.allclose(q1b, q1b_ref, atol=1e-4, rtol=1e-4)
    assert jnp.allclose(q2b, q2b_ref, atol=1e-4, rtol=1e-4)

    print("KERNEL_OK")
</pallas_src>

<mosaic_0001>
module attributes {stable_mosaic.version = 11 : i64} {
  func.func @critic_kernel(%arg0: i32, %arg1: memref<8x8xf32, #tpu.memory_space<vmem>>, %arg2: memref<8x2xf32, #tpu.memory_space<vmem>>, %arg3: memref<8x512xf32, #tpu.memory_space<vmem>>, %arg4: memref<2x512xf32, #tpu.memory_space<vmem>>, %arg5: memref<1x512xf32, #tpu.memory_space<vmem>>, %arg6: memref<256x256xf32, #tpu.memory_space<vmem>>, %arg7: memref<1x256xf32, #tpu.memory_space<vmem>>, %arg8: memref<256x256xf32, #tpu.memory_space<vmem>>, %arg9: memref<1x256xf32, #tpu.memory_space<vmem>>, %arg10: memref<256x128xf32, #tpu.memory_space<vmem>>, %arg11: memref<256x128xf32, #tpu.memory_space<vmem>>, %arg12: memref<1x128xf32, #tpu.memory_space<vmem>>, %arg13: memref<8x128xf32, #tpu.memory_space<vmem>>) attributes {dimension_semantics = [#tpu.dimension_semantics<parallel>], iteration_bounds = array<i64: 1>, scalar_prefetch = 0 : i64, scratch_operands = 0 : i64, tpu.core_type = #tpu.core_type<tc>, window_params = [{transform_indices = @transform_0, window_bounds = array<i64: 8, 8>}, {transform_indices = @transform_1, window_bounds = array<i64: 8, 2>}, {pipeline_mode = #tpu.pipeline_mode<synchronous>, transform_indices = @transform_2, window_bounds = array<i64: 8, 512>}, {pipeline_mode = #tpu.pipeline_mode<synchronous>, transform_indices = @transform_3, window_bounds = array<i64: 2, 512>}, {pipeline_mode = #tpu.pipeline_mode<synchronous>, transform_indices = @transform_4, window_bounds = array<i64: 1, 512>}, {pipeline_mode = #tpu.pipeline_mode<synchronous>, transform_indices = @transform_5, window_bounds = array<i64: 256, 256>}, {pipeline_mode = #tpu.pipeline_mode<synchronous>, transform_indices = @transform_6, window_bounds = array<i64: 1, 256>}, {pipeline_mode = #tpu.pipeline_mode<synchronous>, transform_indices = @transform_7, window_bounds = array<i64: 256, 256>}, {pipeline_mode = #tpu.pipeline_mode<synchronous>, transform_indices = @transform_8, window_bounds = array<i64: 1, 256>}, {pipeline_mode = #tpu.pipeline_mode<synchronous>, transform_indices = @transform_9, window_bounds = array<i64: 256, 128>}, {pipeline_mode = #tpu.pipeline_mode<synchronous>, transform_indices = @transform_10, window_bounds = array<i64: 256, 128>}, {pipeline_mode = #tpu.pipeline_mode<synchronous>, transform_indices = @transform_11, window_bounds = array<i64: 1, 128>}, {transform_indices = @transform_12, window_bounds = array<i64: 8, 128>}]} {
    %c0 = arith.constant 0 : index
    %c0_0 = arith.constant 0 : index
    %0 = vector.load %arg1[%c0, %c0_0] : memref<8x8xf32, #tpu.memory_space<vmem>>, vector<8x8xf32>
    %c0_1 = arith.constant 0 : index
    %c0_2 = arith.constant 0 : index
    %1 = vector.load %arg3[%c0_1, %c0_2] : memref<8x512xf32, #tpu.memory_space<vmem>>, vector<8x512xf32>
    %cst = arith.constant dense<0.000000e+00> : vector<8x512xf32>
    %2 = tpu.matmul %0, %1, %cst {dimension_numbers = #tpu.dot_dimension_numbers<[1], [0], [0], [1], [0, 0, 1, 1], [], []>} : vector<8x8xf32>, vector<8x512xf32>, vector<8x512xf32> -> vector<8x512xf32>
    %c0_3 = arith.constant 0 : index
    %c0_4 = arith.constant 0 : index
    %3 = vector.load %arg2[%c0_3, %c0_4] : memref<8x2xf32, #tpu.memory_space<vmem>>, vector<8x2xf32>
    %c0_5 = arith.constant 0 : index
    %c0_6 = arith.constant 0 : index
    %4 = vector.load %arg4[%c0_5, %c0_6] : memref<2x512xf32, #tpu.memory_space<vmem>>, vector<2x512xf32>
    %cst_7 = arith.constant dense<0.000000e+00> : vector<8x512xf32>
    %5 = tpu.matmul %3, %4, %cst_7 {dimension_numbers = #tpu.dot_dimension_numbers<[1], [0], [0], [1], [0, 0, 1, 1], [], []>} : vector<8x2xf32>, vector<2x512xf32>, vector<8x512xf32> -> vector<8x512xf32>
    %6 = arith.addf %2, %5 : vector<8x512xf32>
    %c0_8 = arith.constant 0 : index
    %c0_9 = arith.constant 0 : index
    %7 = vector.load %arg5[%c0_8, %c0_9] : memref<1x512xf32, #tpu.memory_space<vmem>>, vector<1x512xf32>
    %8 = vector.broadcast %7 : vector<1x512xf32> to vector<8x512xf32>
    %9 = arith.addf %6, %8 : vector<8x512xf32>
    %10 = math.tanh %9 : vector<8x512xf32>
    %11 = vector.extract_strided_slice %10 {offsets = [0, 0], sizes = [8, 256], strides = [1, 1]} : vector<8x512xf32> to vector<8x256xf32>
    %12 = vector.extract_strided_slice %10 {offsets = [0, 256], sizes = [8, 256], strides = [1, 1]} : vector<8x512xf32> to vector<8x256xf32>
    %c0_10 = arith.constant 0 : index
    %c0_11 = arith.constant 0 : index
    %13 = vector.load %arg6[%c0_10, %c0_11] : memref<256x256xf32, #tpu.memory_space<vmem>>, vector<256x256xf32>
    %cst_12 = arith.constant dense<0.000000e+00> : vector<8x256xf32>
    %14 = tpu.matmul %11, %13, %cst_12 {dimension_numbers = #tpu.dot_dimension_numbers<[1], [0], [0], [1], [0, 0, 1, 1], [], []>} : vector<8x256xf32>, vector<256x256xf32>, vector<8x256xf32> -> vector<8x256xf32>
    %c0_13 = arith.constant 0 : index
    %c0_14 = arith.constant 0 : index
    %15 = vector.load %arg7[%c0_13, %c0_14] : memref<1x256xf32, #tpu.memory_space<vmem>>, vector<1x256xf32>
    %16 = vector.broadcast %15 : vector<1x256xf32> to vector<8x256xf32>
    %17 = arith.addf %14, %16 : vector<8x256xf32>
    %18 = math.tanh %17 : vector<8x256xf32>
    %c0_15 = arith.constant 0 : index
    %c0_16 = arith.constant 0 : index
    %19 = vector.load %arg8[%c0_15, %c0_16] : memref<256x256xf32, #tpu.memory_space<vmem>>, vector<256x256xf32>
    %cst_17 = arith.constant dense<0.000000e+00> : vector<8x256xf32>
    %20 = tpu.matmul %12, %19, %cst_17 {dimension_numbers = #tpu.dot_dimension_numbers<[1], [0], [0], [1], [0, 0, 1, 1], [], []>} : vector<8x256xf32>, vector<256x256xf32>, vector<8x256xf32> -> vector<8x256xf32>
    %c0_18 = arith.constant 0 : index
    %c0_19 = arith.constant 0 : index
    %21 = vector.load %arg9[%c0_18, %c0_19] : memref<1x256xf32, #tpu.memory_space<vmem>>, vector<1x256xf32>
    %22 = vector.broadcast %21 : vector<1x256xf32> to vector<8x256xf32>
    %23 = arith.addf %20, %22 : vector<8x256xf32>
    %24 = math.tanh %23 : vector<8x256xf32>
    %c0_20 = arith.constant 0 : index
    %c0_21 = arith.constant 0 : index
    %25 = vector.load %arg10[%c0_20, %c0_21] : memref<256x128xf32, #tpu.memory_space<vmem>>, vector<256x128xf32>
    %cst_22 = arith.constant dense<0.000000e+00> : vector<8x128xf32>
    %26 = tpu.matmul %18, %25, %cst_22 {dimension_numbers = #tpu.dot_dimension_numbers<[1], [0], [0], [1], [0, 0, 1, 1], [], []>} : vector<8x256xf32>, vector<256x128xf32>, vector<8x128xf32> -> vector<8x128xf32>
    %c0_23 = arith.constant 0 : index
    %c0_24 = arith.constant 0 : index
    %27 = vector.load %arg11[%c0_23, %c0_24] : memref<256x128xf32, #tpu.memory_space<vmem>>, vector<256x128xf32>
    %cst_25 = arith.constant dense<0.000000e+00> : vector<8x128xf32>
    %28 = tpu.matmul %24, %27, %cst_25 {dimension_numbers = #tpu.dot_dimension_numbers<[1], [0], [0], [1], [0, 0, 1, 1], [], []>} : vector<8x256xf32>, vector<256x128xf32>, vector<8x128xf32> -> vector<8x128xf32>
    %29 = arith.addf %26, %28 : vector<8x128xf32>
    %c0_26 = arith.constant 0 : index
    %c0_27 = arith.constant 0 : index
    %30 = vector.load %arg12[%c0_26, %c0_27] : memref<1x128xf32, #tpu.memory_space<vmem>>, vector<1x128xf32>
    %31 = vector.broadcast %30 : vector<1x128xf32> to vector<8x128xf32>
    %32 = arith.addf %29, %31 : vector<8x128xf32>
    %c0_28 = arith.constant 0 : index
    %c0_29 = arith.constant 0 : index
    %33 = vector.load %arg13[%c0_28, %c0_29] : memref<8x128xf32, #tpu.memory_space<vmem>>, vector<8x128xf32>
    tpu.vector_store %arg13[%c0_28, %c0_29], %32 {strides = array<i32>} : memref<8x128xf32, #tpu.memory_space<vmem>>, vector<8x128xf32>,
    return
  }
  func.func @transform_0(%arg0: i32) -> (i32, i32) {
    %c0_i32 = arith.constant 0 : i32
    %c0_i32_0 = arith.constant 0 : i32
    return %arg0, %c0_i32 : i32, i32
  }
  func.func @transform_1(%arg0: i32) -> (i32, i32) {
    %c0_i32 = arith.constant 0 : i32
    %c0_i32_0 = arith.constant 0 : i32
    return %arg0, %c0_i32 : i32, i32
  }
  func.func @transform_2(%arg0: i32) -> (i32, i32) {
    %c0_i32 = arith.constant 0 : i32
    %c0_i32_0 = arith.constant 0 : i32
    %c0_i32_1 = arith.constant 0 : i32
    return %c0_i32, %c0_i32_0 : i32, i32
  }
  func.func @transform_3(%arg0: i32) -> (i32, i32) {
    %c0_i32 = arith.constant 0 : i32
    %c0_i32_0 = arith.constant 0 : i32
    %c0_i32_1 = arith.constant 0 : i32
    return %c0_i32, %c0_i32_0 : i32, i32
  }
  func.func @transform_4(%arg0: i32) -> (i32, i32) {
    %c0_i32 = arith.constant 0 : i32
    %c0_i32_0 = arith.constant 0 : i32
    %c0_i32_1 = arith.constant 0 : i32
    return %c0_i32, %c0_i32_0 : i32, i32
  }
  func.func @transform_5(%arg0: i32) -> (i32, i32) {
    %c0_i32 = arith.constant 0 : i32
    %c0_i32_0 = arith.constant 0 : i32
    %c0_i32_1 = arith.constant 0 : i32
    return %c0_i32, %c0_i32_0 : i32, i32
  }
  func.func @transform_6(%arg0: i32) -> (i32, i32) {
    %c0_i32 = arith.constant 0 : i32
    %c0_i32_0 = arith.constant 0 : i32
    %c0_i32_1 = arith.constant 0 : i32
    return %c0_i32, %c0_i32_0 : i32, i32
  }
  func.func @transform_7(%arg0: i32) -> (i32, i32) {
    %c0_i32 = arith.constant 0 : i32
    %c0_i32_0 = arith.constant 0 : i32
    %c0_i32_1 = arith.constant 0 : i32
    return %c0_i32, %c0_i32_0 : i32, i32
  }
  func.func @transform_8(%arg0: i32) -> (i32, i32) {
    %c0_i32 = arith.constant 0 : i32
    %c0_i32_0 = arith.constant 0 : i32
    %c0_i32_1 = arith.constant 0 : i32
    return %c0_i32, %c0_i32_0 : i32, i32
  }
  func.func @transform_9(%arg0: i32) -> (i32, i32) {
    %c0_i32 = arith.constant 0 : i32
    %c0_i32_0 = arith.constant 0 : i32
    %c0_i32_1 = arith.constant 0 : i32
    return %c0_i32, %c0_i32_0 : i32, i32
  }
  func.func @transform_10(%arg0: i32) -> (i32, i32) {
    %c0_i32 = arith.constant 0 : i32
    %c0_i32_0 = arith.constant 0 : i32
    %c0_i32_1 = arith.constant 0 : i32
    return %c0_i32, %c0_i32_0 : i32, i32
  }
  func.func @transform_11(%arg0: i32) -> (i32, i32) {
    %c0_i32 = arith.constant 0 : i32
    %c0_i32_0 = arith.constant 0 : i32
    %c0_i32_1 = arith.constant 0 : i32
    return %c0_i32, %c0_i32_0 : i32, i32
  }
  func.func @transform_12(%arg0: i32) -> (i32, i32) {
    %c0_i32 = arith.constant 0 : i32
    %c0_i32_0 = arith.constant 0 : i32
    return %arg0, %c0_i32 : i32, i32
  }
}

</mosaic_0001>

<bundles_post_ra>
// kernel: critic_forward.1
= control target key start
LH: loop header
LB: loop body
LE: loop exit
PB: predicated region body
PF: predicated region fallthrough
CT: control target
= control target key end

     0   :  { %17 = vsyncpa [#allocation3], 0  ;;  %s1791_s0 = inlined_call_operand.hbm [shape: f32[8,8], index: 0, kind: input, shape index: {}]   ;;  %s1792_s1 = inlined_call_operand.vmem [shape: f32[8,2], index: 1, kind: input, shape index: {}]   ;;  %s1793_s2 = inlined_call_operand.vmem [shape: f32[8,512], index: 2, kind: input, shape index: {}]   ;;  %s1794_s3 = inlined_call_operand.hbm [shape: f32[2,512], index: 3, kind: input, shape index: {}]   ;;  %s1795_s4 = inlined_call_operand.vmem [shape: f32[1,512], index: 4, kind: input, shape index: {}]   ;;  %s1796_s5 = inlined_call_operand.hbm [shape: f32[256,256], index: 5, kind: input, shape index: {}]   ;;  %s1797_s6 = inlined_call_operand.hbm [shape: f32[1,256], index: 6, kind: input, shape index: {}]   ;;  %s1798_s7 = inlined_call_operand.hbm [shape: f32[256,256], index: 7, kind: input, shape index: {}]   ;;  %s1799_s8 = inlined_call_operand.hbm [shape: f32[1,256], index: 8, kind: input, shape index: {}]   ;;  %s1800_s9 = inlined_call_operand.hbm [shape: f32[256,128], index: 9, kind: input, shape index: {}]   ;;  %s1801_s10 = inlined_call_operand.hbm [shape: f32[256,128], index: 10, kind: input, shape index: {}]   ;;  %s1802_s11 = inlined_call_operand.hbm [shape: f32[1,128], index: 11, kind: input, shape index: {}]   ;;  %s1803_s12 = inlined_call_operand.vmem [shape: f32[8,128], index: 12, kind: output, shape index: {}]  }
   0x1   :  { %18 = vsyncpa [#allocation5], 0 }
   0x2   :  { %19 = vsyncpa [#allocation8], 0 }
   0x3   :  { %20 = vsyncpa [#allocation11], 0 }
   0x4   :  { %21 = vsyncpa [#allocation14], 0  ;;  %s1544_s21 = smov [#allocation4]   ;;  %s1545_s23 = smov [#allocation7]  }
   0x5   :  { %s42_s22 = sshll.u32 %s1544_s21, 4  ;;  %s66_s24 = sshll.u32 %s1545_s23, 4  ;;  %s43_s22 = int_to_ptr.vmem [resolvable:$true] %s42_s22  ;;  %s67_s24 = int_to_ptr.vmem [resolvable:$true] %s66_s24 }
   0x6   :  { %s1336_s27 = scalar_lea.hbm %s1794_s3, 128 }
   0x7   :  { %p1337_p0 = scmp.ne.s32.totalorder %s1794_s3, %s1336_s27  ;;  %p1340_p1 = scmp.lt.u32.totalorder %s1336_s27, %s1794_s3 }
   0x9   :  { %p1342_p2 = pnand %p1340_p1, %p1337_p0 }
   0xb   :  { %1345 = shalt.err (!%p1342_p2)
}
   0xc   :  { %s1346_s14 = scalar_lea.vmem %s43_s22, 128  ;;  %p1351_p4 = scmp.lt.s32.totalorder %s43_s22, %s43_s22 }
   0xd   :  { %p1347_p3 = scmp.ne.s32.totalorder %s43_s22, %s1346_s14  ;;  %p1352_p5 = scmp.lt.s32.totalorder %s1346_s14, %s1346_s14 }
   0xf   :  { %p1353_p6 = por %p1352_p5, %p1351_p4 }
  0x11   :  { %p1354_p7 = pnand %p1353_p6, %p1347_p3 }
  0x13   :  { %1357 = shalt.err (!%p1354_p7)
}
  0x14   :  { %45 = dma.hbm_to_vmem [thread:$0]  %s1794_s3, 128, %s43_s22, [#allocation5]  }
  0x15   :  { %s1358_s19 = scalar_lea.hbm %s1797_s6, 32 }
  0x16   :  { %p1359_p8 = scmp.ne.s32.totalorder %s1797_s6, %s1358_s19  ;;  %p1362_p9 = scmp.lt.u32.totalorder %s1358_s19, %s1797_s6 }
  0x18   :  { %p1364_p10 = pnand %p1362_p9, %p1359_p8 }
  0x1a   :  { %1367 = shalt.err (!%p1364_p10)
}
  0x1b   :  { %s1368_s26 = scalar_lea.vmem %s67_s24, 32  ;;  %p1373_p12 = scmp.lt.s32.totalorder %s67_s24, %s67_s24 }
  0x1c   :  { %p1369_p11 = scmp.ne.s32.totalorder %s67_s24, %s1368_s26  ;;  %p1374_p13 = scmp.lt.s32.totalorder %s1368_s26, %s1368_s26 }
  0x1e   :  { %p1375_p0 = por %p1374_p13, %p1373_p12 }
  0x20   :  { %p1376_p1 = pnand %p1375_p0, %p1369_p11 }
  0x22   :  { %1379 = shalt.err (!%p1376_p1)
}
  0x23   :  { %69 = dma.hbm_to_vmem [thread:$0]  %s1797_s6, 32, %s67_s24, [#allocation8]  }
  0x24   :  { %s1546_s27 = smov [#allocation10]   ;;  %s1380_s13 = scalar_lea.hbm %s1799_s8, 32 }
  0x25   :  { %s88_s28 = sshll.u32 %s1546_s27, 4  ;;  %p1381_p2 = scmp.ne.s32.totalorder %s1799_s8, %s1380_s13  ;;  %s89_s28 = int_to_ptr.vmem [resolvable:$true] %s88_s28 }
  0x26   :  { %p1384_p3 = scmp.lt.u32.totalorder %s1380_s13, %s1799_s8 }
  0x28   :  { %p1386_p4 = pnand %p1384_p3, %p1381_p2 }
  0x2a   :  { %1389 = shalt.err (!%p1386_p4)
}
  0x2b   :  { %s1390_s18 = scalar_lea.vmem %s89_s28, 32  ;;  %p1395_p6 = scmp.lt.s32.totalorder %s89_s28, %s89_s28 }
  0x2c   :  { %p1391_p5 = scmp.ne.s32.totalorder %s89_s28, %s1390_s18  ;;  %p1396_p7 = scmp.lt.s32.totalorder %s1390_s18, %s1390_s18 }
  0x2e   :  { %p1397_p8 = por %p1396_p7, %p1395_p6 }
  0x30   :  { %p1398_p9 = pnand %p1397_p8, %p1391_p5 }
  0x32   :  { %1401 = shalt.err (!%p1398_p9)
}
  0x33   :  { %91 = dma.hbm_to_vmem [thread:$0]  %s1799_s8, 32, %s89_s28, [#allocation11]  }
  0x34   :  { %s1547_s19 = smov [#allocation13]   ;;  %s1548_s21 = smov [#allocation2]  }
  0x35   :  { %s109_s20 = sshll.u32 %s1547_s19, 4  ;;  %s28_s23 = sshll.u32 %s1548_s21, 4  ;;  %s110_s20 = int_to_ptr.vmem [resolvable:$true] %s109_s20  ;;  %s29_s23 = int_to_ptr.vmem [resolvable:$true] %s28_s23 }
  0x36   :  { %s1402_s3 = scalar_lea.hbm %s1801_s10, 4096 }
  0x37   :  { %p1403_p10 = scmp.ne.s32.totalorder %s1801_s10, %s1402_s3  ;;  %p1406_p11 = scmp.lt.u32.totalorder %s1402_s3, %s1801_s10 }
  0x39   :  { %p1408_p12 = pnand %p1406_p11, %p1403_p10 }
  0x3b   :  { %1411 = shalt.err (!%p1408_p12)
}
  0x3c   :  { %s1412_s8 = scalar_lea.vmem %s110_s20, 4096  ;;  %p1417_p0 = scmp.lt.s32.totalorder %s110_s20, %s110_s20 }
  0x3d   :  { %p1413_p13 = scmp.ne.s32.totalorder %s110_s20, %s1412_s8  ;;  %p1418_p1 = scmp.lt.s32.totalorder %s1412_s8, %s1412_s8 }
  0x3f   :  { %p1419_p2 = por %p1418_p1, %p1417_p0 }
  0x41   :  { %p1420_p3 = pnand %p1419_p2, %p1413_p13 }
  0x43   :  { %1423 = shalt.err (!%p1420_p3)
}
  0x44   :  { %s1549_s28 = smov 128   ;;  %s1550_s13 = smov 8  }
  0x45   :  { %115 = dma.hbm_to_vmem [thread:$0]  %s1801_s10, 4096, %s110_s20, [#allocation14], %s1549_s28, %s1549_s28, %s1550_s13  }
  0x46   :  { %s1424_s18 = scalar_lea.hbm %s1791_s0, 128 }
  0x47   :  { %p1425_p4 = scmp.ne.s32.totalorder %s1791_s0, %s1424_s18  ;;  %p1428_p5 = scmp.lt.u32.totalorder %s1424_s18, %s1791_s0 }
  0x49   :  { %p1430_p6 = pnand %p1428_p5, %p1425_p4 }
  0x4b   :  { %1433 = shalt.err (!%p1430_p6)
}
  0x4c   :  { %s1434_s25 = scalar_lea.vmem %s29_s23, 128  ;;  %p1439_p8 = scmp.lt.s32.totalorder %s29_s23, %s29_s23 }
  0x4d   :  { %p1435_p7 = scmp.ne.s32.totalorder %s29_s23, %s1434_s25  ;;  %p1440_p9 = scmp.lt.s32.totalorder %s1434_s25, %s1434_s25 }
  0x4f   :  { %p1441_p10 = por %p1440_p9, %p1439_p8 }
  0x51   :  { %p1442_p11 = pnand %p1441_p10, %p1435_p7 }
  0x53   :  { %1445 = shalt.err (!%p1442_p11)
}
  0x54   :  { %31 = dma.hbm_to_vmem [thread:$0]  %s1791_s0, 128, %s29_s23, [#allocation3]  }
  0x55   :  { %s1551_s26 = smov [#allocation6]   ;;  %s1446_s29 = scalar_lea.hbm %s1796_s5, 8192 }
  0x56   :  { %s53_s3 = sshll.u32 %s1551_s26, 4  ;;  %p1447_p12 = scmp.ne.s32.totalorder %s1796_s5, %s1446_s29  ;;  %s54_s3 = int_to_ptr.vmem [resolvable:$true] %s53_s3 }
  0x57   :  { %p1450_p13 = scmp.lt.u32.totalorder %s1446_s29, %s1796_s5 }
  0x59   :  { %p1452_p0 = pnand %p1450_p13, %p1447_p12 }
  0x5b   :  { %1455 = shalt.err (!%p1452_p0)
}
  0x5c   :  { %s1456_s16 = scalar_lea.vmem %s54_s3, 8192  ;;  %p1461_p2 = scmp.lt.s32.totalorder %s54_s3, %s54_s3 }
  0x5d   :  { %p1457_p1 = scmp.ne.s32.totalorder %s54_s3, %s1456_s16  ;;  %p1462_p3 = scmp.lt.s32.totalorder %s1456_s16, %s1456_s16 }
  0x5f   :  { %p1463_p4 = por %p1462_p3, %p1461_p2 }
  0x61   :  { %p1464_p5 = pnand %p1463_p4, %p1457_p1 }
  0x63   :  { %1467 = shalt.err (!%p1464_p5)
}
  0x64   :  { %s1552_s0 = smov 256   ;;  %s1553_s23 = smov 16  }
  0x65   :  { %59 = dma.hbm_to_vmem [thread:$0]  %s1796_s5, 8192, %s54_s3, [#allocation5], %s1552_s0, %s1552_s0, %s1553_s23  }
  0x66   :  { %s1554_s6 = smov [#allocation9]   ;;  %s1555_s19 = smov [#allocation12]  }
  0x67   :  { %s75_s24 = sshll.u32 %s1554_s6, 4  ;;  %s97_s21 = sshll.u32 %s1555_s19, 4  ;;  %s76_s24 = int_to_ptr.vmem [resolvable:$true] %s75_s24  ;;  %s1699_s21 = int_to_ptr.vmem [resolvable:$true] %s97_s21 }
  0x68   :  { %s1468_s20 = scalar_lea.hbm %s1798_s7, 8192 }
  0x69   :  { %p1469_p6 = scmp.ne.s32.totalorder %s1798_s7, %s1468_s20  ;;  %p1472_p7 = scmp.lt.u32.totalorder %s1468_s20, %s1798_s7 }
  0x6b   :  { %p1474_p8 = pnand %p1472_p7, %p1469_p6 }
  0x6d   :  { %1477 = shalt.err (!%p1474_p8)
}
  0x6e   :  { %s1478_s5 = scalar_lea.vmem %s76_s24, 8192  ;;  %p1483_p10 = scmp.lt.s32.totalorder %s76_s24, %s76_s24 }
  0x6f   :  { %p1479_p9 = scmp.ne.s32.totalorder %s76_s24, %s1478_s5  ;;  %p1484_p11 = scmp.lt.s32.totalorder %s1478_s5, %s1478_s5 }
  0x71   :  { %p1485_p12 = por %p1484_p11, %p1483_p10 }
  0x73   :  { %p1486_p13 = pnand %p1485_p12, %p1479_p9 }
  0x75   :  { %1489 = shalt.err (!%p1486_p13)
}
  0x76   :  { %81 = dma.hbm_to_vmem [thread:$0]  %s1798_s7, 8192, %s76_s24, [#allocation8], %s1552_s0, %s1552_s0, %s1553_s23  }
  0x77   :  { %s1490_s15 = scalar_lea.hbm %s1800_s9, 4096 }
  0x78   :  { %p1491_p0 = scmp.ne.s32.totalorder %s1800_s9, %s1490_s15  ;;  %p1494_p1 = scmp.lt.u32.totalorder %s1490_s15, %s1800_s9 }
  0x7a   :  { %p1496_p2 = pnand %p1494_p1, %p1491_p0 }
  0x7c   :  { %1499 = shalt.err (!%p1496_p2)
}
  0x7d   :  { %s1500_s19 = scalar_lea.vmem %s1699_s21, 4096  ;;  %p1505_p4 = scmp.lt.s32.totalorder %s1699_s21, %s1699_s21 }
  0x7e   :  { %p1501_p3 = scmp.ne.s32.totalorder %s1699_s21, %s1500_s19  ;;  %p1506_p5 = scmp.lt.s32.totalorder %s1500_s19, %s1500_s19 }
  0x80   :  { %p1507_p6 = por %p1506_p5, %p1505_p4 }
  0x82   :  { %p1508_p7 = pnand %p1507_p6, %p1501_p3 }
  0x84   :  { %1511 = shalt.err (!%p1508_p7)
}
  0x85   :  { %103 = dma.hbm_to_vmem [thread:$0]  %s1800_s9, 4096, %s1699_s21, [#allocation11], %s1549_s28, %s1549_s28, %s1550_s13  }
  0x86   :  { %s1556_s23 = smov [#allocation15]   ;;  %s1512_s20 = scalar_lea.hbm %s1802_s11, 16 }
  0x87   :  { %s122_s24 = sshll.u32 %s1556_s23, 4  ;;  %p1513_p8 = scmp.ne.s32.totalorder %s1802_s11, %s1512_s20  ;;  %s123_s24 = int_to_ptr.vmem [resolvable:$true] %s122_s24 }
  0x88   :  { %p1516_p9 = scmp.lt.u32.totalorder %s1512_s20, %s1802_s11 }
  0x8a   :  { %p1518_p10 = pnand %p1516_p9, %p1513_p8 }
  0x8c   :  { %1521 = shalt.err (!%p1518_p10)
}
  0x8d   :  { %s1522_s5 = scalar_lea.vmem %s123_s24, 16  ;;  %s1526_s9 = scalar_lea.vmem %s123_s24, 32 }
  0x8e   :  { %p1523_p11 = scmp.ne.s32.totalorder %s123_s24, %s1522_s5  ;;  %p1527_p12 = scmp.lt.s32.totalorder %s123_s24, %s123_s24 }
  0x8f   :  { %p1528_p13 = scmp.lt.s32.totalorder %s1526_s9, %s1522_s5 }
  0x91   :  { %p1529_p0 = por %p1528_p13, %p1527_p12 }
  0x93   :  { %p1530_p1 = pnand %p1529_p0, %p1523_p11 }
  0x95   :  { %1533 = shalt.err (!%p1530_p1)
}
  0x96   :  { %125 = dma.hbm_to_vmem [thread:$0]  %s1802_s11, 16, %s123_s24, [#allocation14]  }
  0x97   :  { %1534 = dma.done.wait [#allocation3], 128  }
  0x98   :  { %1535 = vsyncadd [#allocation3], 4294967168 }
  0x99   :  { %1536 = dma.done.wait [#allocation5], 8320  }
  0x9a   :  { %1537 = vsyncadd [#allocation5], 4294958976 }
  0x9b   :  { %1538 = dma.done.wait [#allocation8], 8224  }
  0x9c   :  { %1539 = vsyncadd [#allocation8], 4294959072 }
  0x9d   :  { %1540 = dma.done.wait [#allocation11], 4128  }
  0x9e   :  { %1541 = vsyncadd [#allocation11], 4294963168 }
  0x9f   :  { %1542 = dma.done.wait [#allocation14], 4112  }
  0xa0   :  { %1543 = vsyncadd [#allocation14], 4294963184  ;;  %v165_v0 = vlaneseq  ;;  %v1557_v1 = vmov 1983009808   ;;  %v1558_v3 = vmov 0.0   ;;  %v159_v7 = vld [vmem:[#allocation4] sm:$0xff] }
  0xa1   :  { %v163_v2 = vunpack.c.l.s4 %v1557_v1  ;;  %255 = vmatprep.mubr.f32.mxu0 %v1558_v3  ;;  %326 = vmatprep.mubr.f32.mxu1 %v1558_v3  ;;  %v161_v9 = vcombine.high %v159_v7, %v159_v7  ;;  %vm182_vm0 = vcmask 1041408   ;;  %v158_v12 = vld [vmem:[%s1792_s1] sm:$0xff]  ;;  %vm178_vm1 = vcmask 15360   ;;  %v155_v13 = vld [vmem:[%s1793_s2 + $0x8] sm:$0xff]  ;;  %v510_v14 = vld [vmem:[#allocation6 + $0x8] sm:$0xff] }
  0xa2   :  { %v1745_v4 = vshrl.u32 %v165_v0, 7  ;;  %v512_v16 = vld [vmem:[#allocation6 + $0x18] sm:$0xff]  ;;  %v659_v17 = vld [vmem:[#allocation9 + $0x8] sm:$0xff]  ;;  %v156_v21 = vld [vmem:[%s1793_s2 + $0x10] sm:$0xff]  ;;  %vm333_vm2 = vcmask 64512  }
  0xa3   :  { %v164_v5 = vunpack.c.0.s8 %v163_v2  ;;  %v661_v18 = vld [vmem:[#allocation9 + $0x18] sm:$0xff]  ;;  %v157_v19 = vld [vmem:[%s1793_s2 + $0x18] sm:$0xff]  ;;  %v154_v20 = vld [vmem:[%s1793_s2] sm:$0xff]  ;;  %v1108_v22 = vpack.c.bf16 %v512_v16, %v510_v14 }
  0xa4   :  { %v1172_v23 = vpack.c.bf16 %v661_v18, %v659_v17  ;;  %v509_v24 = vld [vmem:[#allocation6] sm:$0xff]  ;;  %v511_v25 = vld [vmem:[#allocation6 + $0x10] sm:$0xff]  ;;  %v514_v26 = vld [vmem:[#allocation6 + $0x28] sm:$0xff] }
  0xa5   :  { %v167_v6 = vsub.s32 %v164_v5, %v1745_v4  ;;  %v516_v27 = vld [vmem:[#allocation6 + $0x38] sm:$0xff]  ;;  %v658_v28 = vld [vmem:[#allocation9] sm:$0xff]  ;;  %v153_v30 = vld [vmem:[#allocation2] sm:$0xff]  ;;  %v1110_v31 = vpack.c.bf16 %v511_v25, %v509_v24 }
  0xa6   :  { %v660_v29 = vld [vmem:[#allocation9 + $0x10] sm:$0xff]  ;;  %v663_v32 = vld [vmem:[#allocation9 + $0x28] sm:$0xff]  ;;  %v665_v33 = vld [vmem:[#allocation9 + $0x38] sm:$0xff]  ;;  %v1112_v34 = vpack.c.bf16 %v516_v27, %v514_v26 }
  0xa7   :  { %v168_v8 = vrot.slane %v159_v7, %v167_v6  ;;  %v175_v11 = vrot.slane %v161_v9, %v167_v6  ;;  %v513_v35 = vld [vmem:[#allocation6 + $0x20] sm:$0xff]  ;;  %v515_v36 = vld [vmem:[#allocation6 + $0x30] sm:$0xff]  ;;  %v1174_v37 = vpack.c.bf16 %v660_v29, %v658_v28  ;;  %v518_v38 = vld [vmem:[#allocation6 + $0x48] sm:$0xff]  ;;  %v1176_v40 = vpack.c.bf16 %v665_v33, %v663_v32 }
  0xa8   :  { %v520_v39 = vld [vmem:[#allocation6 + $0x58] sm:$0xff]  ;;  %v662_v41 = vld [vmem:[#allocation9 + $0x20] sm:$0xff]  ;;  %v1114_v43 = vpack.c.bf16 %v515_v36, %v513_v35  ;;  %v667_v44 = vld [vmem:[#allocation9 + $0x48] sm:$0xff] }
  0xa9   :  { %v176_v10 = vcombine.high %v168_v8, %v168_v8  ;;  %v177_v15 = vcombine.high %v175_v11, %v175_v11  ;;  %v664_v42 = vld [vmem:[#allocation9 + $0x30] sm:$0xff]  ;;  %v669_v45 = vld [vmem:[#allocation9 + $0x58] sm:$0xff]  ;;  %v1116_v46 = vpack.c.bf16 %v520_v39, %v518_v38  ;;  %v522_v50 = vld [vmem:[#allocation6 + $0x68] sm:$0xff] }
  0xaa   :  { %v517_v47 = vld [vmem:[#allocation6 + $0x40] sm:$0xff]  ;;  %v519_v48 = vld [vmem:[#allocation6 + $0x50] sm:$0xff]  ;;  %v1178_v49 = vpack.c.bf16 %v664_v42, %v662_v41  ;;  %v524_v51 = vld [vmem:[#allocation6 + $0x78] sm:$0xff]  ;;  %v1180_v52 = vpack.c.bf16 %v669_v45, %v667_v44 }
  0xab   :  { %1029 = vmatprep.subr.msk.mxu0 %vm182_vm0, %v176_v10  ;;  %1032 = vmatprep.subr.msk.mxu1 %vm182_vm0, %v177_v15  ;;  %v666_v53 = vld [vmem:[#allocation9 + $0x40] sm:$0xff]  ;;  %v668_v54 = vld [vmem:[#allocation9 + $0x50] sm:$0xff]  ;;  %v1118_v55 = vpack.c.bf16 %v519_v48, %v517_v47  ;;  %v671_v56 = vld [vmem:[#allocation9 + $0x68] sm:$0xff]  ;;  %v1120_v58 = vpack.c.bf16 %v524_v51, %v522_v50 }
  0xac   :  { %1030 = vmatpush1.msk.msra.mxu0 %vm182_vm0, %v168_v8  ;;  %1033 = vmatpush1.msk.msra.mxu1 %vm182_vm0, %v175_v11  ;;  %v673_v57 = vld [vmem:[#allocation9 + $0x78] sm:$0xff]  ;;  %v523_v60 = vld [vmem:[#allocation6 + $0x70] sm:$0xff]  ;;  %v1182_v61 = vpack.c.bf16 %v668_v54, %v666_v53  ;;  %v526_v62 = vld [vmem:[#allocation6 + $0x88] sm:$0xff] }
  0xad   :  { %1031 = vmatmul.mubr.msk.f32.vlgmr.msra.gmra.mrb[0].mxu0 %vm178_vm1, %v158_v12  ;;  %337 = vmatprep.subr.mxu0 %v155_v13  ;;  %v521_v59 = vld [vmem:[#allocation6 + $0x60] sm:$0xff]  ;;  %v528_v63 = vld [vmem:[#allocation6 + $0x98] sm:$0xff]  ;;  %v1184_v0 = vpack.c.bf16 %v673_v57, %v671_v56  ;;  %v675_v5 = vld [vmem:[#allocation9 + $0x88] sm:$0xff] }
  0xae   :  { %1034 = vmatmul.mubr.msk.f32.vlgmr.msra.gmra.mrb[0].mxu1 %vm178_vm1, %v158_v12  ;;  %408 = vmatprep.subr.mxu1 %v157_v19  ;;  %v670_v1 = vld [vmem:[#allocation9 + $0x60] sm:$0xff]  ;;  %v672_v2 = vld [vmem:[#allocation9 + $0x70] sm:$0xff]  ;;  %v677_v6 = vld [vmem:[#allocation9 + $0x98] sm:$0xff]  ;;  %v1124_v7 = vpack.c.bf16 %v528_v63, %v526_v62 }
  0xaf   :  { %338 = vmatpush1.msra.mxu0 %v154_v20  ;;  %409 = vmatpush1.msra.mxu1 %v156_v21  ;;  %v525_v8 = vld [vmem:[#allocation6 + $0x80] sm:$0xff]  ;;  %v527_v9 = vld [vmem:[#allocation6 + $0x90] sm:$0xff]  ;;  %v1186_v10 = vpack.c.bf16 %v672_v2, %v670_v1  ;;  %v530_v11 = vld [vmem:[#allocation6 + $0xa8] sm:$0xff]  ;;  %v1188_v13 = vpack.c.bf16 %v677_v6, %v675_v5 }
  0xb0   :  { %401 = vmatprep.mubr.f32.mxu0 %v1558_v3  ;;  %472 = vmatprep.mubr.f32.mxu1 %v1558_v3  ;;  %v1122_v3 = vpack.c.bf16 %v523_v60, %v521_v59  ;;  %v532_v12 = vld [vmem:[#allocation6 + $0xb8] sm:$0xff]  ;;  %v674_v14 = vld [vmem:[#allocation9 + $0x80] sm:$0xff]  ;;  %v1126_v16 = vpack.c.bf16 %v527_v9, %v525_v8  ;;  %v679_v17 = vld [vmem:[#allocation9 + $0xa8] sm:$0xff] }
  0xb1   :  { %1109 = vmatprep.subr.bf16.mxu0 %v1108_v22  ;;  %1173 = vmatprep.subr.bf16.mxu1 %v1172_v23  ;;  %v676_v15 = vld [vmem:[#allocation9 + $0x90] sm:$0xff]  ;;  %v681_v18 = vld [vmem:[#allocation9 + $0xb8] sm:$0xff]  ;;  %v1128_v19 = vpack.c.bf16 %v532_v12, %v530_v11  ;;  %v534_v23 = vld [vmem:[#allocation6 + $0xc8] sm:$0xff] }
  0xb2   :  { %v529_v20 = vld [vmem:[#allocation6 + $0xa0] sm:$0xff]  ;;  %v531_v21 = vld [vmem:[#allocation6 + $0xb0] sm:$0xff]  ;;  %v1190_v22 = vpack.c.bf16 %v676_v15, %v674_v14  ;;  %v536_v24 = vld [vmem:[#allocation6 + $0xd8] sm:$0xff]  ;;  %v1192_v25 = vpack.c.bf16 %v681_v18, %v679_v17 }
  0xb3   :  { %v678_v26 = vld [vmem:[#allocation9 + $0xa0] sm:$0xff]  ;;  %v680_v27 = vld [vmem:[#allocation9 + $0xb0] sm:$0xff]  ;;  %v1130_v28 = vpack.c.bf16 %v531_v21, %v529_v20  ;;  %v683_v29 = vld [vmem:[#allocation9 + $0xc8] sm:$0xff] }
  0xb4   :  { %v533_v32 = vld [vmem:[#allocation6 + $0xc0] sm:$0xff]  ;;  %v535_v33 = vld [vmem:[#allocation6 + $0xd0] sm:$0xff]  ;;  %v538_v35 = vld [vmem:[#allocation6 + $0xe8] sm:$0xff] }
  0xb5   :  { %1035 = vmatmul.mubr.msk.f32.vlgmr.msra.gmra.mrb[0].mxu0 %vm333_vm2, %v153_v30  ;;  %v540_v36 = vld [vmem:[#allocation6 + $0xf8] sm:$0xff]  ;;  %v682_v38 = vld [vmem:[#allocation9 + $0xc0] sm:$0xff]  ;;  %v687_v41 = vld [vmem:[#allocation9 + $0xe8] sm:$0xff] }
  0xb6   :  { %1111 = vmatpush1.bf16.msra.mxu0 %v1110_v31  ;;  %1036 = vmatmul.mubr.msk.f32.vlgmr.msra.gmra.mrb[0].mxu1 %vm333_vm2, %v153_v30  ;;  %v685_v30 = vld [vmem:[#allocation9 + $0xd8] sm:$0xff]  ;;  %v1132_v31 = vpack.c.bf16 %v536_v24, %v534_v23  ;;  %v684_v39 = vld [vmem:[#allocation9 + $0xd0] sm:$0xff]  ;;  %v542_v47 = vld [vmem:[#allocation6 + $0x108] sm:$0xff] }
  0xb7   :  { %1113 = vmatprep.subr.bf16.mxu0 %v1112_v34  ;;  %1175 = vmatpush1.bf16.msra.mxu1 %v1174_v37  ;;  %v1194_v34 = vpack.c.bf16 %v680_v27, %v678_v26  ;;  %v1196_v37 = vpack.c.bf16 %v685_v30, %v683_v29  ;;  %v689_v42 = vld [vmem:[#allocation9 + $0xf8] sm:$0xff]  ;;  %v539_v45 = vld [vmem:[#allocation6 + $0xf0] sm:$0xff]  ;;  %v686_v50 = vld [vmem:[#allocation9 + $0xe0] sm:$0xff] }
  0xb8   :  { %1177 = vmatprep.subr.bf16.mxu1 %v1176_v40  ;;  %v1134_v40 = vpack.c.bf16 %v535_v33, %v533_v32  ;;  %v537_v44 = vld [vmem:[#allocation6 + $0xe0] sm:$0xff]  ;;  %v544_v48 = vld [vmem:[#allocation6 + $0x118] sm:$0xff]  ;;  %v691_v53 = vld [vmem:[#allocation9 + $0x108] sm:$0xff] }
  0xb9   :  { %v688_v51 = vld [vmem:[#allocation9 + $0xf0] sm:$0xff]  ;;  %v693_v54 = vld [vmem:[#allocation9 + $0x118] sm:$0xff]  ;;  %v546_v59 = vld [vmem:[#allocation6 + $0x128] sm:$0xff] }
  0xba   :  { %1115 = vmatpush1.bf16.msra.mxu0 %v1114_v43  ;;  %v1136_v43 = vpack.c.bf16 %v540_v36, %v538_v35  ;;  %v541_v56 = vld [vmem:[#allocation6 + $0x100] sm:$0xff]  ;;  %v543_v57 = vld [vmem:[#allocation6 + $0x110] sm:$0xff]  ;;  %v548_v60 = vld [vmem:[#allocation6 + $0x138] sm:$0xff] }
  0xbb   :  { %1117 = vmatprep.subr.bf16.mxu0 %v1116_v46  ;;  %1179 = vmatpush1.bf16.msra.mxu1 %v1178_v49  ;;  %v1198_v46 = vpack.c.bf16 %v684_v39, %v682_v38  ;;  %v1200_v49 = vpack.c.bf16 %v689_v42, %v687_v41  ;;  %v690_v62 = vld [vmem:[#allocation9 + $0x100] sm:$0xff]  ;;  %v692_v63 = vld [vmem:[#allocation9 + $0x110] sm:$0xff]  ;;  %v695_v1 = vld [vmem:[#allocation9 + $0x128] sm:$0xff] }
  0xbc   :  { %1181 = vmatprep.subr.bf16.mxu1 %v1180_v52  ;;  %v1138_v52 = vpack.c.bf16 %v539_v45, %v537_v44  ;;  %v697_v2 = vld [vmem:[#allocation9 + $0x138] sm:$0xff]  ;;  %v547_v6 = vld [vmem:[#allocation6 + $0x130] sm:$0xff]  ;;  %v550_v8 = vld [vmem:[#allocation6 + $0x148] sm:$0xff] }
  0xbd   :  { %v545_v5 = vld [vmem:[#allocation6 + $0x120] sm:$0xff]  ;;  %v552_v9 = vld [vmem:[#allocation6 + $0x158] sm:$0xff]  ;;  %v699_v14 = vld [vmem:[#allocation9 + $0x148] sm:$0xff] }
  0xbe   :  { %1119 = vmatpush1.bf16.msra.mxu0 %v1118_v55  ;;  %v1140_v55 = vpack.c.bf16 %v544_v48, %v542_v47  ;;  %v694_v11 = vld [vmem:[#allocation9 + $0x120] sm:$0xff]  ;;  %v696_v12 = vld [vmem:[#allocation9 + $0x130] sm:$0xff]  ;;  %v701_v15 = vld [vmem:[#allocation9 + $0x158] sm:$0xff] }
  0xbf   :  { %1121 = vmatprep.subr.bf16.mxu0 %v1120_v58  ;;  %1183 = vmatpush1.bf16.msra.mxu1 %v1182_v61  ;;  %v1202_v58 = vpack.c.bf16 %v688_v51, %v686_v50  ;;  %v1204_v61 = vpack.c.bf16 %v693_v54, %v691_v53  ;;  %v549_v17 = vld [vmem:[#allocation6 + $0x140] sm:$0xff]  ;;  %v551_v18 = vld [vmem:[#allocation6 + $0x150] sm:$0xff]  ;;  %v554_v20 = vld [vmem:[#allocation6 + $0x168] sm:$0xff] }
  0xc0   :  { %1185 = vmatprep.subr.bf16.mxu1 %v1184_v0  ;;  %v1142_v0 = vpack.c.bf16 %v543_v57, %v541_v56  ;;  %v556_v21 = vld [vmem:[#allocation6 + $0x178] sm:$0xff]  ;;  %v698_v23 = vld [vmem:[#allocation9 + $0x140] sm:$0xff]  ;;  %v703_v26 = vld [vmem:[#allocation9 + $0x168] sm:$0xff] }
  0xc1   :  { %v700_v24 = vld [vmem:[#allocation9 + $0x150] sm:$0xff]  ;;  %v705_v27 = vld [vmem:[#allocation9 + $0x178] sm:$0xff]  ;;  %v702_v33 = vld [vmem:[#allocation9 + $0x160] sm:$0xff] }
  0xc2   :  { %1123 = vmatpush1.bf16.msra.mxu0 %v1122_v3  ;;  %v1144_v3 = vpack.c.bf16 %v548_v60, %v546_v59  ;;  %v553_v29 = vld [vmem:[#allocation6 + $0x160] sm:$0xff]  ;;  %v555_v30 = vld [vmem:[#allocation6 + $0x170] sm:$0xff]  ;;  %v1216_v32 = vpack.c.bf16 %v705_v27, %v703_v26  ;;  %v560_v38 = vld [vmem:[#allocation6 + $0x198] sm:$0xff] }
  0xc3   :  { %1125 = vmatprep.subr.bf16.mxu0 %v1124_v7  ;;  %1187 = vmatpush1.bf16.msra.mxu1 %v1186_v10  ;;  %v1206_v7 = vpack.c.bf16 %v692_v63, %v690_v62  ;;  %v1208_v10 = vpack.c.bf16 %v697_v2, %v695_v1  ;;  %v1154_v35 = vpack.c.bf16 %v555_v30, %v553_v29  ;;  %v559_v41 = vld [vmem:[#allocation6 + $0x190] sm:$0xff]  ;;  %v709_v44 = vld [vmem:[#allocation9 + $0x198] sm:$0xff]  ;;  %v1778_v30 = vsub.s32 1, %v1745_v4 }
  0xc4   :  { %1189 = vmatprep.subr.bf16.mxu1 %v1188_v13  ;;  %v1146_v13 = vpack.c.bf16 %v547_v6, %v545_v5  ;;  %v708_v47 = vld [vmem:[#allocation9 + $0x190] sm:$0xff]  ;;  %v713_v56 = vld [vmem:[#allocation9 + $0x1b8] sm:$0xff]  ;;  %v715_v2 = vld [vmem:[#allocation9 + $0x1c8] sm:$0xff] }
  0xc5   :  { %v564_v50 = vld [vmem:[#allocation6 + $0x1b8] sm:$0xff]  ;;  %v563_v53 = vld [vmem:[#allocation6 + $0x1b0] sm:$0xff]  ;;  %v714_v6 = vld [vmem:[#allocation9 + $0x1c0] sm:$0xff] }
  0xc6   :  { %1127 = vmatpush1.bf16.msra.mxu0 %v1126_v16  ;;  %v1148_v16 = vpack.c.bf16 %v552_v9, %v550_v8  ;;  %v712_v59 = vld [vmem:[#allocation9 + $0x1b0] sm:$0xff]  ;;  %v717_v5 = vld [vmem:[#allocation9 + $0x1d8] sm:$0xff] }
  0xc7   :  { %1129 = vmatprep.subr.bf16.mxu0 %v1128_v19  ;;  %1191 = vmatpush1.bf16.msra.mxu1 %v1190_v22  ;;  %v1210_v19 = vpack.c.bf16 %v696_v12, %v694_v11  ;;  %v1212_v22 = vpack.c.bf16 %v701_v15, %v699_v14  ;;  %v568_v62 = vld [vmem:[#allocation6 + $0x1d8] sm:$0xff]  ;;  %v567_v1 = vld [vmem:[#allocation6 + $0x1d0] sm:$0xff]  ;;  %v1228_v8 = vpack.c.bf16 %v717_v5, %v715_v2  ;;  %v569_v12 = vld [vmem:[#allocation6 + $0x1e0] sm:$0xff] }
  0xc8   :  { %1193 = vmatprep.subr.bf16.mxu1 %v1192_v25  ;;  %v1150_v25 = vpack.c.bf16 %v551_v18, %v549_v17  ;;  %v572_v11 = vld [vmem:[#allocation6 + $0x1f8] sm:$0xff]  ;;  %v571_v14 = vld [vmem:[#allocation6 + $0x1f0] sm:$0xff] }
  0xc9   :  { %v719_v15 = vld [vmem:[#allocation9 + $0x1e8] sm:$0xff]  ;;  %v1170_v17 = vpack.c.bf16 %v571_v14, %v569_v12 }
  0xca   :  { %1131 = vmatpush1.bf16.msra.mxu0 %v1130_v28  ;;  %v1152_v28 = vpack.c.bf16 %v556_v21, %v554_v20  ;;  %v720_v20 = vld [vmem:[#allocation9 + $0x1f0] sm:$0xff] }
  0xcb   :  { %1133 = vmatprep.subr.bf16.mxu0 %v1132_v31  ;;  %1195 = vmatpush1.bf16.msra.mxu1 %v1194_v34  ;;  %v1214_v31 = vpack.c.bf16 %v700_v24, %v698_v23  ;;  %v704_v34 = vld [vmem:[#allocation9 + $0x170] sm:$0xff] }
  0xcc   :  { %1197 = vmatprep.subr.bf16.mxu1 %v1196_v37  ;;  %v1218_v36 = vpack.c.bf16 %v704_v34, %v702_v33  ;;  %v558_v37 = vld [vmem:[#allocation6 + $0x188] sm:$0xff]  ;;  %v479_v29 = vld [vmem:[%s1795_s4] sm:$0xf] }
  0xcd   :  { %v1156_v39 = vpack.c.bf16 %v560_v38, %v558_v37  ;;  %v824_v23 = vld [vmem:[#allocation12 + $0x88] sm:$0xff]  ;;  %v488_v34 = vrot.slane %v479_v29, %v1778_v30 }
  0xce   :  { %1135 = vmatpush1.bf16.msra.mxu0 %v1134_v40  ;;  %v557_v40 = vld [vmem:[#allocation6 + $0x180] sm:$0xff]  ;;  %v856_v26 = vld [vmem:[#allocation13 + $0x88] sm:$0xff] }
  0xcf   :  { %1137 = vmatprep.subr.bf16.mxu0 %v1136_v43  ;;  %1199 = vmatpush1.bf16.msra.mxu1 %v1198_v46  ;;  %v1158_v42 = vpack.c.bf16 %v559_v41, %v557_v40  ;;  %v707_v43 = vld [vmem:[#allocation9 + $0x188] sm:$0xff]  ;;  %v706_v46 = vld [vmem:[#allocation9 + $0x180] sm:$0xff] }
  0xd0   :  { %1201 = vmatprep.subr.bf16.mxu1 %v1200_v49  ;;  %v1220_v45 = vpack.c.bf16 %v709_v44, %v707_v43  ;;  %v1222_v48 = vpack.c.bf16 %v708_v47, %v706_v46  ;;  %v562_v49 = vld [vmem:[#allocation6 + $0x1a8] sm:$0xff]  ;;  %v857_v46 = vld [vmem:[#allocation13 + $0x90] sm:$0xff]  ;;  %v858_v47 = vld [vmem:[#allocation13 + $0x98] sm:$0xff] }
  0xd1   :  { %v1160_v51 = vpack.c.bf16 %v564_v50, %v562_v49  ;;  %v808_v49 = vld [vmem:[#allocation12 + $0x8] sm:$0xff] }
  0xd2   :  { %1139 = vmatpush1.bf16.msra.mxu0 %v1138_v52  ;;  %v561_v52 = vld [vmem:[#allocation6 + $0x1a0] sm:$0xff]  ;;  %v828_v5 = vld [vmem:[#allocation12 + $0xa8] sm:$0xff] }
  0xd3   :  { %1141 = vmatprep.subr.bf16.mxu0 %v1140_v55  ;;  %1203 = vmatpush1.bf16.msra.mxu1 %v1202_v58  ;;  %v1162_v54 = vpack.c.bf16 %v563_v53, %v561_v52  ;;  %v711_v55 = vld [vmem:[#allocation9 + $0x1a8] sm:$0xff]  ;;  %v710_v58 = vld [vmem:[#allocation9 + $0x1a0] sm:$0xff] }
  0xd4   :  { %1205 = vmatprep.subr.bf16.mxu1 %v1204_v61  ;;  %v1224_v57 = vpack.c.bf16 %v713_v56, %v711_v55  ;;  %v1226_v60 = vpack.c.bf16 %v712_v59, %v710_v58  ;;  %v566_v61 = vld [vmem:[#allocation6 + $0x1c8] sm:$0xff]  ;;  %v826_v52 = vld [vmem:[#allocation12 + $0x98] sm:$0xff]  ;;  %v841_v55 = vld [vmem:[#allocation13 + $0x10] sm:$0xff] }
  0xd5   :  { %v1164_v63 = vpack.c.bf16 %v568_v62, %v566_v61  ;;  %v842_v56 = vld [vmem:[#allocation13 + $0x18] sm:$0xff]  ;;  %v859_v59 = vld [vmem:[#allocation13 + $0xa0] sm:$0xff]  ;;  %v812_v14 = vld [vmem:[#allocation12 + $0x28] sm:$0xff] }
  0xd6   :  { %1143 = vmatpush1.bf16.msra.mxu0 %v1142_v0  ;;  %v565_v0 = vld [vmem:[#allocation6 + $0x1c0] sm:$0xff]  ;;  %v1242_v2 = vpack.c.bf16 %v842_v56, %v841_v55  ;;  %v820_v56 = vld [vmem:[#allocation12 + $0x68] sm:$0xff] }
  0xd7   :  { %1145 = vmatprep.subr.bf16.mxu0 %v1144_v3  ;;  %1207 = vmatpush1.bf16.msra.mxu1 %v1206_v7  ;;  %v1166_v3 = vpack.c.bf16 %v567_v1, %v565_v0  ;;  %v716_v7 = vld [vmem:[#allocation9 + $0x1d0] sm:$0xff]  ;;  %v810_v0 = vld [vmem:[#allocation12 + $0x18] sm:$0xff]  ;;  %v819_v55 = vld [vmem:[#allocation12 + $0x60] sm:$0xff] }
  0xd8   :  { %1209 = vmatprep.subr.bf16.mxu1 %v1208_v10  ;;  %v1230_v9 = vpack.c.bf16 %v716_v7, %v714_v6  ;;  %v570_v10 = vld [vmem:[#allocation6 + $0x1e8] sm:$0xff] }
  0xd9   :  { %v843_v7 = vld [vmem:[#allocation13 + $0x20] sm:$0xff] }
  0xda   :  { %1147 = vmatpush1.bf16.msra.mxu0 %v1146_v13  ;;  %v1168_v13 = vpack.c.bf16 %v572_v11, %v570_v10  ;;  %v861_v10 = vld [vmem:[#allocation13 + $0xb0] sm:$0xff]  ;;  %v862_v11 = vld [vmem:[#allocation13 + $0xb8] sm:$0xff] }
  0xdb   :  { %1149 = vmatprep.subr.bf16.mxu0 %v1148_v16  ;;  %1211 = vmatpush1.bf16.msra.mxu1 %v1210_v19  ;;  %v721_v16 = vld [vmem:[#allocation9 + $0x1f8] sm:$0xff]  ;;  %v718_v19 = vld [vmem:[#allocation9 + $0x1e0] sm:$0xff] }
  0xdc   :  { %1213 = vmatprep.subr.bf16.mxu1 %v1212_v22  ;;  %v1232_v18 = vpack.c.bf16 %v721_v16, %v719_v15  ;;  %v1234_v21 = vpack.c.bf16 %v720_v20, %v718_v19  ;;  %v823_v22 = vld [vmem:[#allocation12 + $0x80] sm:$0xff]  ;;  %v829_v16 = vld [vmem:[#allocation12 + $0xb0] sm:$0xff]  ;;  %v846_v20 = vld [vmem:[#allocation13 + $0x38] sm:$0xff] }
  0xdd   :  { %v1268_v24 = vpack.c.bf16 %v824_v23, %v823_v22  ;;  %v845_v19 = vld [vmem:[#allocation13 + $0x30] sm:$0xff] }
  0xde   :  { %1151 = vmatpush1.bf16.msra.mxu0 %v1150_v25  ;;  %v855_v25 = vld [vmem:[#allocation13 + $0x80] sm:$0xff]  ;;  %v813_v23 = vld [vmem:[#allocation12 + $0x30] sm:$0xff] }
  0xdf   :  { %1153 = vmatprep.subr.bf16.mxu0 %v1152_v28  ;;  %1215 = vmatpush1.bf16.msra.mxu1 %v1214_v31  ;;  %v1236_v27 = vpack.c.bf16 %v856_v26, %v855_v25  ;;  %v1772_v28 = vsub.s32 0, %v1745_v4  ;;  %v491_v31 = vsub.s32 2, %v1745_v4  ;;  %v1250_v25 = vpack.c.bf16 %v846_v20, %v845_v19 }
  0xe0   :  { %1217 = vmatprep.subr.bf16.mxu1 %v1216_v32  ;;  %v495_v32 = vsub.s32 3, %v1745_v4  ;;  %v840_v4 = vld [vmem:[#allocation13 + $0x8] sm:$0xff] }
  0xe1   :  { %v484_v33 = vrot.slane %v479_v29, %v1772_v28 }
  0xe2   :  { %1155 = vmatpush1.bf16.msra.mxu0 %v1154_v35  ;;  %v492_v35 = vrot.slane %v479_v29, %v491_v31  ;;  %v496_v37 = vrot.slane %v479_v29, %v495_v32  ;;  %v832_v29 = vld [vmem:[#allocation12 + $0xc8] sm:$0xff]  ;;  %v815_v32 = vld [vmem:[#allocation12 + $0x40] sm:$0xff] }
  0xe3   :  { %1219 = vmatpush1.bf16.msra.mxu1 %v1218_v36  ;;  %1157 = vmatprep.subr.bf16.mxu0 %v1156_v39 }
  0xe4   :  { %1221 = vmatprep.subr.bf16.mxu1 %v1220_v45  ;;  %v839_v45 = vld [vmem:[#allocation13] sm:$0xff] }
  0xe5   :  { %v1238_v50 = vpack.c.bf16 %v840_v4, %v839_v45  ;;  %v818_v45 = vld [vmem:[#allocation12 + $0x58] sm:$0xff] }
  0xe6   :  { %1159 = vmatpush1.bf16.msra.mxu0 %v1158_v42 }
  0xe7   :  { %1223 = vmatpush1.bf16.msra.mxu1 %v1222_v48  ;;  %1161 = vmatprep.subr.bf16.mxu0 %v1160_v51  ;;  %v807_v48 = vld [vmem:[#allocation12] sm:$0xff]  ;;  %v825_v51 = vld [vmem:[#allocation12 + $0x90] sm:$0xff] }
  0xe8   :  { %1225 = vmatprep.subr.bf16.mxu1 %v1224_v57  ;;  %v1270_v58 = vpack.c.bf16 %v808_v49, %v807_v48  ;;  %v1272_v62 = vpack.c.bf16 %v826_v52, %v825_v51  ;;  %v849_v49 = vld [vmem:[#allocation13 + $0x50] sm:$0xff]  ;;  %v835_v52 = vld [vmem:[#allocation12 + $0xe0] sm:$0xff] }
  0xea   :  { %1163 = vmatpush1.bf16.msra.mxu0 %v1162_v54  ;;  %v1240_v54 = vpack.c.bf16 %v858_v47, %v857_v46  ;;  %v865_v46 = vld [vmem:[#allocation13 + $0xd0] sm:$0xff]  ;;  %v866_v47 = vld [vmem:[#allocation13 + $0xd8] sm:$0xff] }
  0xeb   :  { %1227 = vmatpush1.bf16.msra.mxu1 %v1226_v60  ;;  %1165 = vmatprep.subr.bf16.mxu0 %v1164_v63  ;;  %v860_v60 = vld [vmem:[#allocation13 + $0xa8] sm:$0xff]  ;;  %v809_v63 = vld [vmem:[#allocation12 + $0x10] sm:$0xff]  ;;  %v1256_v48 = vpack.c.bf16 %v866_v47, %v865_v46 }
  0xec   :  { %1229 = vmatprep.subr.bf16.mxu1 %v1228_v8  ;;  %v1244_v6 = vpack.c.bf16 %v860_v60, %v859_v59  ;;  %v844_v8 = vld [vmem:[#allocation13 + $0x28] sm:$0xff]  ;;  %v851_v60 = vld [vmem:[#allocation13 + $0x60] sm:$0xff] }
  0xed   :  { %v1246_v15 = vpack.c.bf16 %v844_v8, %v843_v7  ;;  %v868_v59 = vld [vmem:[#allocation13 + $0xe8] sm:$0xff]  ;;  %v870_v7 = vld [vmem:[#allocation13 + $0xf8] sm:$0xff] }
  0xee   :  { %1167 = vmatpush1.bf16.msra.mxu0 %v1166_v3  ;;  %v827_v3 = vld [vmem:[#allocation12 + $0xa0] sm:$0xff] }
  0xef   :  { %1231 = vmatpush1.bf16.msra.mxu1 %v1230_v9  ;;  %1169 = vmatprep.subr.bf16.mxu0 %v1168_v13  ;;  %v1274_v9 = vpack.c.bf16 %v810_v0, %v809_v63  ;;  %v1276_v12 = vpack.c.bf16 %v828_v5, %v827_v3  ;;  %v811_v13 = vld [vmem:[#allocation12 + $0x20] sm:$0xff]  ;;  %v837_v0 = vld [vmem:[#allocation12 + $0xf0] sm:$0xff]  ;;  %v822_v5 = vld [vmem:[#allocation12 + $0x78] sm:$0xff] }
  0xf0   :  { %1233 = vmatprep.subr.bf16.mxu1 %v1232_v18  ;;  %v1248_v18 = vpack.c.bf16 %v862_v11, %v861_v10  ;;  %v853_v10 = vld [vmem:[#allocation13 + $0x70] sm:$0xff]  ;;  %v854_v11 = vld [vmem:[#allocation13 + $0x78] sm:$0xff] }
  0xf2   :  { %1171 = vmatpush1.bf16.msra.mxu0 %v1170_v17  ;;  %v830_v17 = vld [vmem:[#allocation12 + $0xb8] sm:$0xff] }
  0xf3   :  { %1235 = vmatpush1.bf16.msra.mxu1 %v1234_v21  ;;  %1237 = vmatprep.subr.bf16.mxu0 %v1236_v27  ;;  %v1278_v21 = vpack.c.bf16 %v812_v14, %v811_v13  ;;  %v1280_v22 = vpack.c.bf16 %v830_v17, %v829_v16  ;;  %v831_v27 = vld [vmem:[#allocation12 + $0xc0] sm:$0xff]  ;;  %v573_v13 = vld [vmem:[#allocation7] sm:$0x3]  ;;  %v722_v14 = vld [vmem:[#allocation10] sm:$0x3] }
  0xf4   :  { %1269 = vmatprep.subr.bf16.mxu1 %v1268_v24  ;;  %v814_v24 = vld [vmem:[#allocation12 + $0x38] sm:$0xff]  ;;  %v1284_v31 = vpack.c.bf16 %v832_v29, %v831_v27  ;;  %v582_v16 = vrot.slane %v573_v13, %v1778_v30  ;;  %v727_v17 = vrot.slane %v722_v14, %v1772_v28  ;;  %v731_v19 = vrot.slane %v722_v14, %v1778_v30 }
  0xf5   :  { %v1282_v26 = vpack.c.bf16 %v814_v24, %v813_v23 }
 0x188   :  { %v403_v36 = vpop.f32.mrb[0].mxu0 }
 0x189   :  { %v501_v38 = vadd.f32 %v484_v33, %v403_v36  ;;  %v405_v39 = vpop.f32.mrb[1].mxu0  ;;  %v474_v41 = vpop.f32.mrb[0].mxu1  ;;  %v816_v33 = vld [vmem:[#allocation12 + $0x48] sm:$0xff] }
 0x18a   :  { %v502_v40 = vadd.f32 %v488_v34, %v405_v39  ;;  %v503_v42 = vadd.f32 %v492_v35, %v474_v41  ;;  %v476_v43 = vpop.f32.mrb[1].mxu1  ;;  %v1286_v34 = vpack.c.bf16 %v816_v33, %v815_v32  ;;  %v863_v35 = vld [vmem:[#allocation13 + $0xc0] sm:$0xff]  ;;  %v864_v36 = vld [vmem:[#allocation13 + $0xc8] sm:$0xff]  ;;  %v833_v41 = vld [vmem:[#allocation12 + $0xd0] sm:$0xff] }
 0x18b   :  { %v504_v44 = vadd.f32 %v496_v37, %v476_v43  ;;  %v1252_v37 = vpack.c.bf16 %v864_v36, %v863_v35  ;;  %v848_v39 = vld [vmem:[#allocation13 + $0x48] sm:$0xff] }
 0x18c   :  { %1320 = vtanh.f32 %v502_v40 }
 0x18d   :  { %1322 = vtanh.f32 %v501_v38  ;;  %v847_v38 = vld [vmem:[#allocation13 + $0x40] sm:$0xff] }
 0x18e   :  { %1324 = vtanh.f32 %v504_v44  ;;  %v1254_v40 = vpack.c.bf16 %v848_v39, %v847_v38  ;;  %v817_v44 = vld [vmem:[#allocation12 + $0x50] sm:$0xff] }
 0x18f   :  { %1326 = vtanh.f32 %v503_v42  ;;  %v834_v42 = vld [vmem:[#allocation12 + $0xd8] sm:$0xff]  ;;  %v1290_v4 = vpack.c.bf16 %v818_v45, %v817_v44 }
 0x190   :  { %v1288_v43 = vpack.c.bf16 %v834_v42, %v833_v41 }
 0x196   :  { %v1321_v53 = vpop.eup %1320 }
 0x197   :  { %v1323_v57 = vpop.eup %1322  ;;  %649 = vmatprep.mubr.f32.mxu0 %v1321_v53  ;;  %v836_v53 = vld [vmem:[#allocation12 + $0xe8] sm:$0xff] }
 0x198   :  { %v1325_v61 = vpop.eup %1324  ;;  %650 = vmatmul.mubr.f32.vlgmr.msra.gmra.mrb[2].mxu0 %v1323_v57  ;;  %v867_v57 = vld [vmem:[#allocation13 + $0xe0] sm:$0xff] }
 0x199   :  { %v1327_v1 = vpop.eup %1326  ;;  %798 = vmatprep.mubr.f32.mxu1 %v1325_v61  ;;  %1239 = vmatpush3.bf16.msra.mxu0 %v1238_v50  ;;  %v850_v50 = vld [vmem:[#allocation13 + $0x58] sm:$0xff]  ;;  %v852_v61 = vld [vmem:[#allocation13 + $0x68] sm:$0xff] }
 0x19a   :  { %799 = vmatmul.mubr.f32.vlgmr.msra.gmra.mrb[2].mxu1 %v1327_v1  ;;  %1241 = vmatprep.subr.bf16.mxu0 %v1240_v54  ;;  %v1258_v51 = vpack.c.bf16 %v850_v50, %v849_v49  ;;  %v1292_v54 = vpack.c.bf16 %v836_v53, %v835_v52  ;;  %v1262_v63 = vpack.c.bf16 %v852_v61, %v851_v60  ;;  %v838_v1 = vld [vmem:[#allocation12 + $0xf8] sm:$0xff] }
 0x19b   :  { %1271 = vmatpush3.bf16.msra.mxu1 %v1270_v58  ;;  %v1294_v58 = vpack.c.bf16 %v820_v56, %v819_v55  ;;  %v1296_v3 = vpack.c.bf16 %v838_v1, %v837_v0 }
 0x19c   :  { %1273 = vmatprep.subr.bf16.mxu1 %v1272_v62  ;;  %v1260_v62 = vpack.c.bf16 %v868_v59, %v867_v57 }
 0x19d   :  { %1243 = vmatpush3.bf16.msra.mxu0 %v1242_v2  ;;  %v821_v2 = vld [vmem:[#allocation12 + $0x70] sm:$0xff] }
 0x19e   :  { %1245 = vmatprep.subr.bf16.mxu0 %v1244_v6  ;;  %v869_v6 = vld [vmem:[#allocation13 + $0xf0] sm:$0xff]  ;;  %v1298_v8 = vpack.c.bf16 %v822_v5, %v821_v2 }
 0x19f   :  { %1275 = vmatpush3.bf16.msra.mxu1 %v1274_v9  ;;  %v1264_v9 = vpack.c.bf16 %v870_v7, %v869_v6 }
 0x1a0   :  { %1277 = vmatprep.subr.bf16.mxu1 %v1276_v12  ;;  %v1266_v12 = vpack.c.bf16 %v854_v11, %v853_v10 }
 0x1a1   :  { %1247 = vmatpush3.bf16.msra.mxu0 %v1246_v15  ;;  %v578_v15 = vrot.slane %v573_v13, %v1772_v28 }
 0x1a2   :  { %1249 = vmatprep.subr.bf16.mxu0 %v1248_v18 }
 0x1a3   :  { %1279 = vmatpush3.bf16.msra.mxu1 %v1278_v21 }
 0x1a4   :  { %1281 = vmatprep.subr.bf16.mxu1 %v1280_v22 }
 0x1a5   :  { %1251 = vmatpush3.bf16.msra.mxu0 %v1250_v25 }
 0x1a6   :  { %1253 = vmatprep.subr.bf16.mxu0 %v1252_v37  ;;  %v1037_v37 = vld [vmem:[#allocation15] ss:$0 sm:$0xff] }
 0x1a7   :  { %1283 = vmatpush3.bf16.msra.mxu1 %v1282_v26 }
 0x1a8   :  { %1285 = vmatprep.subr.bf16.mxu1 %v1284_v31 }
 0x1a9   :  { %1255 = vmatpush3.bf16.msra.mxu0 %v1254_v40 }
 0x1aa   :  { %1257 = vmatprep.subr.bf16.mxu0 %v1256_v48 }
 0x1ab   :  { %1287 = vmatpush3.bf16.msra.mxu1 %v1286_v34 }
 0x1ac   :  { %1289 = vmatprep.subr.bf16.mxu1 %v1288_v43 }
 0x1ad   :  { %1259 = vmatpush3.bf16.msra.mxu0 %v1258_v51 }
 0x1ae   :  { %1261 = vmatprep.subr.bf16.mxu0 %v1260_v62 }
 0x1af   :  { %1291 = vmatpush3.bf16.msra.mxu1 %v1290_v4 }
 0x1b0   :  { %1293 = vmatprep.subr.bf16.mxu1 %v1292_v54 }
 0x1b1   :  { %1263 = vmatpush3.bf16.msra.mxu0 %v1262_v63 }
 0x1b2   :  { %1265 = vmatprep.subr.bf16.mxu0 %v1264_v9 }
 0x1b3   :  { %1295 = vmatpush3.bf16.msra.mxu1 %v1294_v58 }
 0x1b4   :  { %1297 = vmatprep.subr.bf16.mxu1 %v1296_v3 }
 0x1b5   :  { %1267 = vmatpush3.bf16.msra.mxu0 %v1266_v12 }
 0x1b7   :  { %1299 = vmatpush3.bf16.msra.mxu1 %v1298_v8 }
 0x26b   :  { %v651_v18 = vpop.f32.mrb[2].mxu0 }
 0x26c   :  { %v652_v20 = vadd.f32 %v651_v18, %v578_v15  ;;  %v653_v21 = vpop.f32.mrb[3].mxu0 }
 0x26d   :  { %v654_v22 = vadd.f32 %v653_v21, %v582_v16  ;;  %v800_v23 = vpop.f32.mrb[2].mxu1 }
 0x26e   :  { %v801_v24 = vadd.f32 %v800_v23, %v727_v17  ;;  %v802_v25 = vpop.f32.mrb[3].mxu1 }
 0x26f   :  { %1328 = vtanh.f32 %v654_v22  ;;  %v803_v26 = vadd.f32 %v802_v25, %v731_v19 }
 0x270   :  { %1330 = vtanh.f32 %v652_v20 }
 0x271   :  { %1332 = vtanh.f32 %v803_v26 }
 0x272   :  { %1334 = vtanh.f32 %v801_v24 }
 0x279   :  { %v1329_v27 = vpop.eup %1328 }
 0x27a   :  { %v1331_v29 = vpop.eup %1330  ;;  %1005 = vmatprep.mubr.f32.mxu1 %v1329_v27 }
 0x27b   :  { %v1333_v31 = vpop.eup %1332  ;;  %1006 = vmatmul.mubr.f32.vlgmr.msra.gmra.mrb[4].mxu1 %v1331_v29 }
 0x27c   :  { %v1335_v28 = vpop.eup %1334  ;;  %935 = vmatprep.mubr.f32.mxu0 %v1333_v31 }
 0x27d   :  { %936 = vmatmul.mubr.f32.vlgmr.msra.gmra.mrb[4].mxu0 %v1335_v28 }
 0x34e   :  { %v1105_v30 = vpop.f32.mrb[4].mxu1 }
 0x34f   :  { %v1106_v32 = vpop.f32.mrb[5].mxu1 }
 0x350   :  { %v1107_v33 = vadd.f32 %v1106_v32, %v1105_v30  ;;  %v1070_v34 = vpop.f32.mrb[4].mxu0 }
 0x351   :  { %v1071_v35 = vpop.f32.mrb[5].mxu0 }
 0x352   :  { %v1072_v36 = vadd.f32 %v1071_v35, %v1070_v34 }
 0x354   :  { %v1008_v38 = vadd.f32 %v1107_v33, %v1072_v36 }
 0x356   :  { %v1018_v39 = vadd.f32 %v1037_v37, %v1008_v38 }
 0x358   :  { %1019 = vst [vmem:[%s1803_s12] sm:$0xff] %v1018_v39 }
 0x359   :  { %1024 = vsyncpa [#allocation3], 1 }
 0x35a   :  { %1025 = vsyncpa [#allocation5], 1 }
 0x35b   :  { %1026 = vsyncpa [#allocation8], 1 }
 0x35c   :  { %1027 = vsyncpa [#allocation11], 1 }
 0x35d   :  { %1028 = vsyncpa [#allocation14], 1 }

</bundles_post_ra>
